<compile_context>
chip_gen: v5e
topology: v5e:2x2
jax: 0.10.0
libtpu: 0.0.40
codegen_flags: <defaults>
</compile_context>

<pallas_src>
import functools

import jax
import jax.numpy as jnp
from jax import lax
from jax.experimental import pallas as pl
from jax.experimental.pallas import tpu as pltpu


def _round_up(x: int, m: int) -> int:
    return ((x + m - 1) // m) * m


# ----------------------------------------------------------------------------------
# Path 1: streaming kernel (safe default, caller keeps `embed` valid, PyTorch-like).
# ----------------------------------------------------------------------------------
def _prompts_stream_kernel(ctx_full_ref, embed_ref, out_ref, *, n_ctx):
    """out = where(row in [1, 1+n_ctx), ctx_full, embed) for one (tile_B, L, D) block."""
    _, seq_len, dim = embed_ref.shape
    row = lax.broadcasted_iota(jnp.int32, (seq_len, dim), 0)
    in_ctx = (row >= 1) & (row < 1 + n_ctx)                       # (L, D) bool
    out_ref[...] = jnp.where(
        in_ctx[None, :, :],
        ctx_full_ref[...][None, :, :],                            # (1, L, D) broadcast
        embed_ref[...],                                           # (tile_B, L, D)
    )


def build_prompts(embed: jax.Array, ctx: jax.Array, *, block_budget_bytes: int = 3 << 20) -> jax.Array:
    """embed: (B, L, D), ctx: (n_ctx, D) -> prompts: (B, L, D). Streams embed once."""
    B, L, D = embed.shape
    n_ctx, ctx_dim = ctx.shape
    if ctx_dim != D:
        raise ValueError(f"ctx dim {ctx_dim} != embed dim {D}")
    if L < 1 + n_ctx:
        raise ValueError(f"sequence length {L} too short for 1 prefix + {n_ctx} ctx tokens")

    dtype = embed.dtype
    # Wrapper-side layout plumbing: place ctx rows at offset [1, 1+n_ctx) of an (L, D)
    # slab so the kernel never needs a sublane-offset partial store.
    ctx_full = jnp.zeros((L, D), dtype=dtype).at[1:1 + n_ctx, :].set(ctx.astype(dtype))

    itemsize = jnp.dtype(dtype).itemsize
    row_bytes = _round_up(L, 8) * _round_up(D, 128) * itemsize     # padded VMEM bytes / batch row
    tile_b = int(max(1, min(B, block_budget_bytes // max(row_bytes, 1))))
    grid = (int(pl.cdiv(B, tile_b)),)

    # 2x double-buffering for embed-in and out blocks, plus the small ctx_full block.
    vmem_limit = int(max(4 << 20, 4 * tile_b * row_bytes + 2 * row_bytes + (2 << 20)))

    kernel = functools.partial(_prompts_stream_kernel, n_ctx=n_ctx)
    return pl.pallas_call(
        kernel,
        out_shape=jax.ShapeDtypeStruct((B, L, D), dtype),
        grid=grid,
        in_specs=[
            pl.BlockSpec((L, D), lambda b: (0, 0)),                # ctx slab, constant block
            pl.BlockSpec((tile_b, L, D), lambda b: (b, 0, 0)),     # embed tile
        ],
        out_specs=pl.BlockSpec((tile_b, L, D), lambda b: (b, 0, 0)),
        compiler_params=pltpu.CompilerParams(
            dimension_semantics=("parallel",),
            vmem_limit_bytes=vmem_limit,
        ),
    )(ctx_full, embed)


# ----------------------------------------------------------------------------------
# Path 2: in-place scatter kernel (use with a DONATED embed buffer).
# ----------------------------------------------------------------------------------
def _ctx_scatter_kernel(embed_hbm_ref, ctx_ref, out_hbm_ref, staging_ref, sem, *, batch_chunk):
    """One coalesced strided DMA per grid chunk: staging (bc, n_ctx, D) -> out rows [1, 1+n_ctx)."""
    del embed_hbm_ref  # Aliased to out_hbm_ref; prefix/suffix rows are already correct.

    n_ctx, dim = ctx_ref.shape
    batch = out_hbm_ref.shape[0]
    bc = batch_chunk

    # Fill the staging buffer once (scratch persists across the sequential grid).
    @pl.when(pl.program_id(0) == 0)
    def _fill():
        staging_ref[...] = jnp.broadcast_to(ctx_ref[...][None, :, :], (bc, n_ctx, dim))

    # Static chunk size; tail chunk re-writes a few already-written rows (idempotent).
    base = jnp.minimum(pl.program_id(0) * bc, batch - bc)
    cp = pltpu.make_async_copy(
        staging_ref,
        out_hbm_ref.at[pl.ds(base, bc), pl.ds(1, n_ctx), :],
        sem.at[0],
    )
    cp.start()
    cp.wait()


def build_prompts_inplace(embed: jax.Array, ctx: jax.Array, *, staging_budget_bytes: int = 8 << 20) -> jax.Array:
    """embed: (B, L, D), ctx: (n_ctx, D) -> prompts aliasing embed's buffer.

    Intended for a donated `embed` (e.g. jax.jit(..., donate_argnums=(0,))); then the
    only HBM traffic is the ~B*n_ctx*D-byte ctx scatter.  Without donation XLA inserts
    a full-buffer copy first — prefer `build_prompts` in that case.
    """
    B, L, D = embed.shape
    n_ctx, ctx_dim = ctx.shape
    if ctx_dim != D:
        raise ValueError(f"ctx dim {ctx_dim} != embed dim {D}")
    if L < 1 + n_ctx:
        raise ValueError(f"sequence length {L} too short for 1 prefix + {n_ctx} ctx tokens")

    ctx = ctx.astype(embed.dtype)
    itemsize = jnp.dtype(embed.dtype).itemsize

    # Padded VMEM footprint of one batch row of the staging buffer (last 2 dims tiled).
    row_bytes = _round_up(n_ctx, 8) * _round_up(D, 128) * itemsize
    bc = int(max(1, min(B, staging_budget_bytes // max(row_bytes, 1))))
    num_chunks = int(pl.cdiv(B, bc))

    ctx_block_bytes = _round_up(n_ctx, 8) * _round_up(D, 128) * itemsize
    vmem_limit = int(max(4 << 20, bc * row_bytes + 2 * ctx_block_bytes + (2 << 20)))

    kernel = functools.partial(_ctx_scatter_kernel, batch_chunk=bc)
    return pl.pallas_call(
        kernel,
        out_shape=jax.ShapeDtypeStruct((B, L, D), embed.dtype),
        grid=(num_chunks,),
        in_specs=[
            pl.BlockSpec(memory_space=pl.ANY),                     # embed stays in HBM (aliased)
            pl.BlockSpec((n_ctx, D), lambda c: (0, 0)),            # tiny ctx block, VMEM resident
        ],
        out_specs=pl.BlockSpec(memory_space=pl.ANY),
        scratch_shapes=[
            pltpu.VMEM((bc, n_ctx, D), embed.dtype),               # staging buffer
            pltpu.SemaphoreType.DMA((1,)),
        ],
        input_output_aliases={0: 0},
        compiler_params=pltpu.CompilerParams(
            dimension_semantics=("arbitrary",),                    # fill-once => sequential grid
            vmem_limit_bytes=vmem_limit,
            has_side_effects=True,                                 # all writes are manual DMAs
        ),
    )(embed, ctx)


# ----------------------------------------------------------------------------------
# Module-level wrapper mirroring the PyTorch PromptLearner.
# ----------------------------------------------------------------------------------
class PromptLearner:
    """JAX/Pallas re-implementation of the PyTorch PromptLearner forward."""

    def __init__(self, n_ctx: int, ctx_dim: int, key, n_cls: int = 1000, dtype=jnp.float32):
        self.n_cls = n_cls
        self.n_ctx = n_ctx
        # nn.init.normal_(ctx_vectors, std=0.02)
        self.ctx = (0.02 * jax.random.normal(key, (n_ctx, ctx_dim))).astype(dtype)
        self.ctx_init_state = None

    def __call__(self, embed: jax.Array, t: bool) -> jax.Array:
        # PyTorch expands ctx to (2, ...) if t else (n_cls, ...); embed's batch must match.
        expected = 2 if t else self.n_cls
        assert embed.shape[0] == expected, (
            f"embed batch {embed.shape[0]} must equal {'2' if t else 'n_cls'}={expected}"
        )
        # Non-donated, PyTorch-like call: caller's embed stays valid, so use the fused
        # streaming kernel (one read + one write of B*L*D, no extra alias-copy pass).
        return build_prompts(embed, self.ctx)

    # Host-side parameter bookkeeping (no kernel work involved).
    def set_prompt_init_states(self):
        self.ctx_init_state = self.ctx

    def reset(self):
        assert self.ctx_init_state is not None
        self.ctx = self.ctx_init_state


if __name__ == "__main__":
    key = jax.random.PRNGKey(0)
    k_ctx, k_embed = jax.random.split(key)

    # Small synthetic shapes consistent with the module's forward.
    n_cls = 8
    n_ctx = 4
    ctx_dim = 32
    seq_len = 16        # L = 1 (prefix) + n_ctx + 11 (suffix)
    t = True
    B = 2 if t else n_cls

    learner = PromptLearner(n_ctx, ctx_dim, k_ctx, n_cls=n_cls, dtype=jnp.float32)
    embed = jax.random.normal(k_embed, (B, seq_len, ctx_dim), dtype=jnp.float32)

    # Pure-JAX reference of the PyTorch concatenation semantics, materialized BEFORE
    # the donated kernel call so the embed buffer can safely be donated afterwards.
    ctx_exp = jnp.broadcast_to(
        learner.ctx.astype(embed.dtype)[None, :, :], (B, n_ctx, ctx_dim)
    )
    ref = jnp.concatenate([embed[:, :1, :], ctx_exp, embed[:, 1 + n_ctx:, :]], axis=1)
    ref = jax.block_until_ready(ref)

    # 1) Module-style call: fused streaming kernel (embed not donated, stays valid).
    prompts = jax.block_until_ready(learner(embed, t))
    assert prompts.shape == (B, seq_len, ctx_dim)
    assert jnp.allclose(prompts, ref), "Pallas output mismatch vs reference (streaming)"

    # 2) High-performance donated path: embed's buffer becomes the output and the
    #    kernel only DMA-scatters the ctx rows (no full-copy HBM traffic).
    donating = jax.jit(build_prompts_inplace, donate_argnums=(0,))
    prompts_donated = jax.block_until_ready(donating(embed, learner.ctx))
    assert prompts_donated.shape == (B, seq_len, ctx_dim)
    assert jnp.allclose(prompts_donated, ref), "Pallas output mismatch vs reference (donated)"

    print("KERNEL_OK")
</pallas_src>

<mosaic_0001>
module attributes {stable_mosaic.version = 11 : i64} {
  func.func @_prompts_stream_kernel(%arg0: i32, %arg1: memref<16x32xf32, #tpu.memory_space<vmem>>, %arg2: memref<2x16x32xf32, #tpu.memory_space<vmem>>, %arg3: memref<2x16x32xf32, #tpu.memory_space<vmem>>) attributes {dimension_semantics = [#tpu.dimension_semantics<parallel>], iteration_bounds = array<i64: 1>, scalar_prefetch = 0 : i64, scratch_operands = 0 : i64, tpu.core_type = #tpu.core_type<tc>, window_params = [{pipeline_mode = #tpu.pipeline_mode<synchronous>, transform_indices = @transform_0, window_bounds = array<i64: 16, 32>}, {transform_indices = @transform_1, window_bounds = array<i64: 2, 16, 32>}, {transform_indices = @transform_2, window_bounds = array<i64: 2, 16, 32>}]} {
    %0 = tpu.iota {dimensions = array<i32: 0>} : vector<16x32xi32>
    %c1_i32 = arith.constant 1 : i32
    %1 = vector.broadcast %c1_i32 : i32 to vector<16x32xi32>
    %2 = arith.cmpi sge, %0, %1 : vector<16x32xi32>
    %c5_i32 = arith.constant 5 : i32
    %3 = vector.broadcast %c5_i32 : i32 to vector<16x32xi32>
    %4 = arith.cmpi slt, %0, %3 : vector<16x32xi32>
    %5 = arith.andi %2, %4 : vector<16x32xi1>
    %6 = vector.shape_cast %5 : vector<16x32xi1> to vector<1x16x32xi1>
    %c0 = arith.constant 0 : index
    %c0_0 = arith.constant 0 : index
    %7 = vector.load %arg1[%c0, %c0_0] : memref<16x32xf32, #tpu.memory_space<vmem>>, vector<16x32xf32>
    %8 = vector.shape_cast %7 : vector<16x32xf32> to vector<1x16x32xf32>
    %c0_1 = arith.constant 0 : index
    %c0_2 = arith.constant 0 : index
    %c0_3 = arith.constant 0 : index
    %9 = vector.load %arg2[%c0_1, %c0_2, %c0_3] : memref<2x16x32xf32, #tpu.memory_space<vmem>>, vector<2x16x32xf32>
    %10 = vector.shape_cast %6 : vector<1x16x32xi1> to vector<1x16x32xi1>
    %11 = vector.broadcast %10 : vector<1x16x32xi1> to vector<2x16x32xi1>
    %12 = vector.shape_cast %8 : vector<1x16x32xf32> to vector<1x16x32xf32>
    %13 = vector.broadcast %12 : vector<1x16x32xf32> to vector<2x16x32xf32>
    %14 = arith.select %11, %13, %9 : vector<2x16x32xi1>, vector<2x16x32xf32>
    %c0_4 = arith.constant 0 : index
    %c0_5 = arith.constant 0 : index
    %c0_6 = arith.constant 0 : index
    %15 = vector.load %arg3[%c0_4, %c0_5, %c0_6] : memref<2x16x32xf32, #tpu.memory_space<vmem>>, vector<2x16x32xf32>
    tpu.vector_store %arg3[%c0_4, %c0_5, %c0_6], %14 {strides = array<i32>} : memref<2x16x32xf32, #tpu.memory_space<vmem>>, vector<2x16x32xf32>,
    return
  }
  func.func @transform_0(%arg0: i32) -> (i32, i32) {
    %c0_i32 = arith.constant 0 : i32
    %c0_i32_0 = arith.constant 0 : i32
    %c0_i32_1 = arith.constant 0 : i32
    return %c0_i32, %c0_i32_0 : i32, i32
  }
  func.func @transform_1(%arg0: i32) -> (i32, i32, i32) {
    %c0_i32 = arith.constant 0 : i32
    %c0_i32_0 = arith.constant 0 : i32
    %c0_i32_1 = arith.constant 0 : i32
    return %arg0, %c0_i32, %c0_i32_0 : i32, i32, i32
  }
  func.func @transform_2(%arg0: i32) -> (i32, i32, i32) {
    %c0_i32 = arith.constant 0 : i32
    %c0_i32_0 = arith.constant 0 : i32
    %c0_i32_1 = arith.constant 0 : i32
    return %arg0, %c0_i32, %c0_i32_0 : i32, i32, i32
  }
}

</mosaic_0001>

<bundles_post_ra>
// kernel: tpu_custom_call.1
= control target key start
LH: loop header
LB: loop body
LE: loop exit
PB: predicated region body
PF: predicated region fallthrough
CT: control target
= control target key end

     0   :  { %7 = vsyncpa [#allocation3], 0  ;;  %s225_s0 = inlined_call_operand.hbm [shape: f32[16,32], index: 0, kind: input, shape index: {}]   ;;  %s226_s1 = inlined_call_operand.hbm [shape: f32[2,16,32], index: 1, kind: input, shape index: {}]   ;;  %s227_s2 = inlined_call_operand.hbm [shape: f32[2,16,32], index: 2, kind: output, shape index: {}]  }
   0x1   :  { %8 = vsyncpa [#allocation6], 0 }
   0x2   :  { %9 = vsyncpa [#allocation4], 0  ;;  %s14_s11 = sshll.u32 %s225_s0, 4  ;;  %s175_s12 = smov [#allocation2]   ;;  %s15_s11 = int_to_ptr.hbm [resolvable:$true] %s14_s11 }
   0x3   :  { %s16_s13 = sshll.u32 %s175_s12, 4  ;;  %s27_s16 = sshll.u32 %s226_s1, 4  ;;  %s17_s13 = int_to_ptr.vmem [resolvable:$true] %s16_s13  ;;  %s28_s16 = int_to_ptr.hbm [resolvable:$true] %s27_s16 }
   0x4   :  { %s176_s17 = smov 128   ;;  %s177_s18 = smov 8  }
   0x5   :  { %22 = dma.hbm_to_vmem [thread:$0]  %s15_s11, 256, %s17_s13, [#allocation3], %s176_s17, %s176_s17, %s177_s18  }
   0x6   :  { %s178_s19 = smov [#allocation5]  }
   0x7   :  { %s29_s20 = sshll.u32 %s178_s19, 4  ;;  %s30_s20 = int_to_ptr.vmem [resolvable:$true] %s29_s20 }
   0x8   :  { %35 = dma.hbm_to_vmem [thread:$0]  %s28_s16, 512, %s30_s20, [#allocation6], %s176_s17, %s176_s17, %s177_s18  }
   0x9   :  { %169 = dma.done.wait [#allocation3], 256  }
   0xa   :  { %170 = vsyncadd [#allocation3], 4294967040 }
   0xb   :  { %171 = dma.done.wait [#allocation6], 512  }
   0xc   :  { %172 = vsyncadd [#allocation6], 4294966784  ;;  %v44_v0 = vlaneseq  ;;  %vm67_vm3 = vcmask 261120   ;;  %s179_s0 = smov [#allocation7]   ;;  %s78_s23 = sshll.u32 %s227_s2, 4  ;;  %v53_v3 = vld [vmem:[#allocation2] sm:$0xff]  ;;  %s79_s23 = int_to_ptr.hbm [resolvable:$true] %s78_s23 }
   0xd   :  { %s76_s1 = sshll.u32 %s179_s0, 4  ;;  %v55_v4 = vld [vmem:[#allocation5] sm:$0xff]  ;;  %v56_v5 = vld [vmem:[#allocation5 + $0x8] sm:$0xff]  ;;  %v57_v7 = vld [vmem:[#allocation5 + $0x10] sm:$0xff]  ;;  %s77_s1 = int_to_ptr.vmem [resolvable:$true] %s76_s1 }
   0xe   :  { %v45_v1 = vshrl.u32 %v44_v0, 7  ;;  %69 = vst.msk [vmem:[#allocation7 + $0x8] sm:$0xff] %vm67_vm3, %v56_v5  ;;  %v58_v8 = vld [vmem:[#allocation5 + $0x18] sm:$0xff] }
   0xf   :  { %71 = vst.msk [vmem:[#allocation7 + $0x18] sm:$0xff] %vm67_vm3, %v58_v8 }
  0x10   :  { %vm47_vm0 = vcmp.ge.s32.totalorder %v45_v1, 1  ;;  %vm49_vm1 = vcmp.lt.s32.totalorder %v45_v1, 5 }
  0x11   :  { %vm207_vm2 = vmand %vm47_vm0, %vm49_vm1 }
  0x12   :  { %v63_v6 = vsel %vm207_vm2, %v53_v3, %v55_v4  ;;  %v65_v9 = vsel %vm207_vm2, %v53_v3, %v57_v7 }
  0x13   :  { %68 = vst.msk [vmem:[#allocation7] sm:$0xff] %vm67_vm3, %v63_v6 }
  0x14   :  { %70 = vst.msk [vmem:[#allocation7 + $0x10] sm:$0xff] %vm67_vm3, %v65_v9 }
  0x15   :  { %84 = dma.vmem_to_hbm [thread:$0]  %s77_s1, 512, %s79_s23, [#allocation4], %s176_s17, %s176_s17, %s177_s18  }
  0x16   :  { %173 = dma.done.wait [#allocation4], 512  }
  0x17   :  { %174 = vsyncadd [#allocation4], 4294966784 }
  0x18   :  { %89 = vsyncpa [#allocation3], 1 }
  0x19   :  { %90 = vsyncpa [#allocation6], 1 }
  0x1a   :  { %91 = vsyncpa [#allocation4], 1 }

</bundles_post_ra>
